<compile_context>
chip_gen: v5e
topology: v5e:2x2
jax: 0.10.0
libtpu: 0.0.40
codegen_flags: <defaults>
</compile_context>

<pallas_src>
import functools

import jax
import jax.numpy as jnp
from jax.experimental import pallas as pl
from jax.experimental.pallas import tpu as pltpu


def fitness_mlp_kernel(x_ref, w1_ref, b1_ref, w2_ref, b2_ref, o_ref):
    # fc1: (TILE_B, 132) @ (132, 128) on the MXU, bf16 operands, f32 accumulation.
    x = x_ref[...].astype(jnp.bfloat16)
    h = jnp.dot(x, w1_ref[...], preferred_element_type=jnp.float32)
    # bias + ReLU in f32 on the VPU (v5e has no bf16 VPU; free under the DMA bound).
    h = jnp.maximum(h + b1_ref[...], 0.0)
    # fc2: (TILE_B, 128) @ (128, 3), bf16 operands, f32 accumulation + f32 bias.
    out = jnp.dot(h.astype(jnp.bfloat16), w2_ref[...],
                  preferred_element_type=jnp.float32)
    o_ref[...] = (out + b2_ref[...]).astype(o_ref.dtype)


def _round_up(a, m):
    return (a + m - 1) // m * m


_MIN_TILE = 512  # floor tile size once we start splitting the batch into steps


def _choose_tile_b(B, cap):
    """Sublane-aligned batch tile, <= cap, with >=2-4 grid steps for larger B."""
    tb = min(cap, _round_up(B, 8))
    if B > _MIN_TILE:
        # Keep ~4 grid steps (floor 512 rows) so the auto double-buffered pipeline
        # overlaps DMA with compute and v7x's 2 TensorCores both get work.
        tb = min(tb, max(_MIN_TILE, _round_up(pl.cdiv(B, 4), 8)))
    return max(_round_up(tb, 8), 8)


@functools.partial(jax.jit, static_argnames=("tile_b",))
def fitness_model_forward(x, w1, b1, w2, b2, *, tile_b=2048):
    """x: (B, input_size) f32.  Returns (B, num_classes) f32."""
    B, in_size = x.shape
    hidden = w1.shape[1]
    num_classes = w2.shape[1]

    tb = _choose_tile_b(B, tile_b)
    grid = (pl.cdiv(B, tb),)  # ragged last block handled by Pallas (no padding copy)

    # Weights go to the MXU in bf16 (f32 accumulation).  Tiny + VMEM-resident.
    w1_bf = w1.astype(jnp.bfloat16)
    w2_bf = w2.astype(jnp.bfloat16)

    flops = 2 * B * in_size * hidden + 2 * B * hidden * num_classes
    bytes_accessed = (
        B * (in_size + num_classes) * 4               # stream x in, logits out (f32)
        + (in_size * hidden + hidden * num_classes) * 2  # bf16 weights, loaded once
        + (hidden + num_classes) * 4                     # f32 biases
    )

    return pl.pallas_call(
        fitness_mlp_kernel,
        out_shape=jax.ShapeDtypeStruct((B, num_classes), jnp.float32),
        grid=grid,
        in_specs=[
            # x: tiled along batch, streamed per grid step (double-buffered DMA).
            pl.BlockSpec((tb, in_size), lambda i: (i, 0)),
            # Weights / biases: constant block index -> VMEM-resident across steps.
            pl.BlockSpec((in_size, hidden), lambda i: (0, 0)),
            pl.BlockSpec((1, hidden), lambda i: (0, 0)),
            pl.BlockSpec((hidden, num_classes), lambda i: (0, 0)),
            pl.BlockSpec((1, num_classes), lambda i: (0, 0)),
        ],
        out_specs=pl.BlockSpec((tb, num_classes), lambda i: (i, 0)),
        compiler_params=pltpu.CompilerParams(
            dimension_semantics=("parallel",),  # shard batch tiles across TCs (v7x)
        ),
        cost_estimate=pl.CostEstimate(
            flops=flops, transcendentals=0, bytes_accessed=bytes_accessed
        ),
    )(x, w1_bf, b1, w2_bf, b2)


def init_params(key, input_size=132, hidden=128, num_classes=3):
    """Deterministic init mimicking nn.Linear's default (uniform +/- 1/sqrt(fan_in))."""
    k1, k2, k3, k4 = jax.random.split(key, 4)
    bound1 = 1.0 / jnp.sqrt(input_size)
    bound2 = 1.0 / jnp.sqrt(hidden)
    # Stored as (in, out) so the kernel does x @ W directly (PyTorch stores (out, in)).
    w1 = jax.random.uniform(k1, (input_size, hidden), jnp.float32, -bound1, bound1)
    b1 = jax.random.uniform(k2, (1, hidden), jnp.float32, -bound1, bound1)
    w2 = jax.random.uniform(k3, (hidden, num_classes), jnp.float32, -bound2, bound2)
    b2 = jax.random.uniform(k4, (1, num_classes), jnp.float32, -bound2, bound2)
    return w1, b1, w2, b2


if __name__ == "__main__":
    key = jax.random.PRNGKey(0)
    k_x, k_x2, k_p = jax.random.split(key, 3)

    input_size, num_classes = 132, 3
    w1, b1, w2, b2 = init_params(k_p, input_size=input_size, num_classes=num_classes)

    def ref_forward(x):  # f32 reference
        return jnp.maximum(x @ w1 + b1, 0.0) @ w2 + b2

    # bf16 MXU operands -> loosened tolerance vs the f32 reference.
    TOL = dict(atol=5e-2, rtol=5e-2)

    # Small batch: single grid step, tile == batch.
    batch = 8
    x = jax.random.normal(k_x, (batch, input_size), jnp.float32)
    out = fitness_model_forward(x, w1, b1, w2, b2)
    jax.block_until_ready(out)
    assert out.shape == (batch, num_classes)
    assert jnp.allclose(out, ref_forward(x), **TOL)

    # Non-divisible batch: exercises the ragged last block (grid of 2, no padding copy).
    batch2 = 300
    x2 = jax.random.normal(k_x2, (batch2, input_size), jnp.float32)
    out2 = fitness_model_forward(x2, w1, b1, w2, b2, tile_b=256)
    jax.block_until_ready(out2)
    assert out2.shape == (batch2, num_classes)
    assert jnp.allclose(out2, ref_forward(x2), **TOL)

    print("KERNEL_OK")
</pallas_src>

<mosaic_0001>
module attributes {stable_mosaic.version = 11 : i64} {
  func.func @fitness_mlp_kernel(%arg0: i32, %arg1: memref<8x132xf32, #tpu.memory_space<vmem>>, %arg2: memref<132x128xbf16, #tpu.memory_space<vmem>>, %arg3: memref<1x128xf32, #tpu.memory_space<vmem>>, %arg4: memref<128x3xbf16, #tpu.memory_space<vmem>>, %arg5: memref<1x3xf32, #tpu.memory_space<vmem>>, %arg6: memref<8x3xf32, #tpu.memory_space<vmem>>) attributes {dimension_semantics = [#tpu.dimension_semantics<parallel>], iteration_bounds = array<i64: 1>, scalar_prefetch = 0 : i64, scratch_operands = 0 : i64, tpu.core_type = #tpu.core_type<tc>, window_params = [{transform_indices = @transform_0, window_bounds = array<i64: 8, 132>}, {pipeline_mode = #tpu.pipeline_mode<synchronous>, transform_indices = @transform_1, window_bounds = array<i64: 132, 128>}, {pipeline_mode = #tpu.pipeline_mode<synchronous>, transform_indices = @transform_2, window_bounds = array<i64: 1, 128>}, {pipeline_mode = #tpu.pipeline_mode<synchronous>, transform_indices = @transform_3, window_bounds = array<i64: 128, 3>}, {pipeline_mode = #tpu.pipeline_mode<synchronous>, transform_indices = @transform_4, window_bounds = array<i64: 1, 3>}, {transform_indices = @transform_5, window_bounds = array<i64: 8, 3>}]} {
    %c0 = arith.constant 0 : index
    %c0_0 = arith.constant 0 : index
    %0 = vector.load %arg1[%c0, %c0_0] : memref<8x132xf32, #tpu.memory_space<vmem>>, vector<8x132xf32>
    %1 = arith.truncf %0 : vector<8x132xf32> to vector<8x132xbf16>
    %c0_1 = arith.constant 0 : index
    %c0_2 = arith.constant 0 : index
    %2 = vector.load %arg2[%c0_1, %c0_2] : memref<132x128xbf16, #tpu.memory_space<vmem>>, vector<132x128xbf16>
    %cst = arith.constant dense<0.000000e+00> : vector<8x128xf32>
    %3 = tpu.matmul %1, %2, %cst {dimension_numbers = #tpu.dot_dimension_numbers<[1], [0], [0], [1], [0, 0, 1, 1], [], []>} : vector<8x132xbf16>, vector<132x128xbf16>, vector<8x128xf32> -> vector<8x128xf32>
    %c0_3 = arith.constant 0 : index
    %c0_4 = arith.constant 0 : index
    %4 = vector.load %arg3[%c0_3, %c0_4] : memref<1x128xf32, #tpu.memory_space<vmem>>, vector<1x128xf32>
    %5 = vector.broadcast %4 : vector<1x128xf32> to vector<8x128xf32>
    %6 = arith.addf %3, %5 : vector<8x128xf32>
    %cst_5 = arith.constant 0.000000e+00 : f32
    %7 = vector.broadcast %cst_5 : f32 to vector<8x128xf32>
    %8 = arith.maximumf %6, %7 : vector<8x128xf32>
    %9 = arith.truncf %8 : vector<8x128xf32> to vector<8x128xbf16>
    %c0_6 = arith.constant 0 : index
    %c0_7 = arith.constant 0 : index
    %10 = vector.load %arg4[%c0_6, %c0_7] : memref<128x3xbf16, #tpu.memory_space<vmem>>, vector<128x3xbf16>
    %cst_8 = arith.constant dense<0.000000e+00> : vector<8x3xf32>
    %11 = tpu.matmul %9, %10, %cst_8 {dimension_numbers = #tpu.dot_dimension_numbers<[1], [0], [0], [1], [0, 0, 1, 1], [], []>} : vector<8x128xbf16>, vector<128x3xbf16>, vector<8x3xf32> -> vector<8x3xf32>
    %c0_9 = arith.constant 0 : index
    %c0_10 = arith.constant 0 : index
    %12 = vector.load %arg5[%c0_9, %c0_10] : memref<1x3xf32, #tpu.memory_space<vmem>>, vector<1x3xf32>
    %13 = vector.broadcast %12 : vector<1x3xf32> to vector<8x3xf32>
    %14 = arith.addf %11, %13 : vector<8x3xf32>
    %c0_11 = arith.constant 0 : index
    %c0_12 = arith.constant 0 : index
    %15 = vector.load %arg6[%c0_11, %c0_12] : memref<8x3xf32, #tpu.memory_space<vmem>>, vector<8x3xf32>
    tpu.vector_store %arg6[%c0_11, %c0_12], %14 {strides = array<i32>} : memref<8x3xf32, #tpu.memory_space<vmem>>, vector<8x3xf32>,
    return
  }
  func.func @transform_0(%arg0: i32) -> (i32, i32) {
    %c0_i32 = arith.constant 0 : i32
    %c0_i32_0 = arith.constant 0 : i32
    return %arg0, %c0_i32 : i32, i32
  }
  func.func @transform_1(%arg0: i32) -> (i32, i32) {
    %c0_i32 = arith.constant 0 : i32
    %c0_i32_0 = arith.constant 0 : i32
    %c0_i32_1 = arith.constant 0 : i32
    return %c0_i32, %c0_i32_0 : i32, i32
  }
  func.func @transform_2(%arg0: i32) -> (i32, i32) {
    %c0_i32 = arith.constant 0 : i32
    %c0_i32_0 = arith.constant 0 : i32
    %c0_i32_1 = arith.constant 0 : i32
    return %c0_i32, %c0_i32_0 : i32, i32
  }
  func.func @transform_3(%arg0: i32) -> (i32, i32) {
    %c0_i32 = arith.constant 0 : i32
    %c0_i32_0 = arith.constant 0 : i32
    %c0_i32_1 = arith.constant 0 : i32
    return %c0_i32, %c0_i32_0 : i32, i32
  }
  func.func @transform_4(%arg0: i32) -> (i32, i32) {
    %c0_i32 = arith.constant 0 : i32
    %c0_i32_0 = arith.constant 0 : i32
    %c0_i32_1 = arith.constant 0 : i32
    return %c0_i32, %c0_i32_0 : i32, i32
  }
  func.func @transform_5(%arg0: i32) -> (i32, i32) {
    %c0_i32 = arith.constant 0 : i32
    %c0_i32_0 = arith.constant 0 : i32
    return %arg0, %c0_i32 : i32, i32
  }
}

</mosaic_0001>

<bundles_post_ra>
// kernel: fitness_model_forward.1
= control target key start
LH: loop header
LB: loop body
LE: loop exit
PB: predicated region body
PF: predicated region fallthrough
CT: control target
= control target key end

     0   :  { %vm101_vm0 = vcmask 1041408   ;;  %vm97_vm1 = vcmask 31744   ;;  %vm214_vm2 = vcmask 23552   ;;  %s399_s1 = inlined_call_operand.vmem [shape: bf16[132,128], index: 1, kind: input, shape index: {}]   ;;  %s400_s3 = inlined_call_operand.vmem [shape: bf16[128,3], index: 3, kind: input, shape index: {}]   ;;  %s401_s0 = inlined_call_operand.vmem [shape: f32[8,132], index: 0, kind: input, shape index: {}]   ;;  %s402_s2 = inlined_call_operand.vmem [shape: f32[1,128], index: 2, kind: input, shape index: {}]   ;;  %s403_s4 = inlined_call_operand.vmem [shape: f32[1,3], index: 4, kind: input, shape index: {}]   ;;  %s404_s5 = inlined_call_operand.vmem [shape: f32[8,3], index: 5, kind: output, shape index: {}]  }
   0x1   :  { %v292_v0 = vld [vmem:[%s399_s1 + $0x38] sm:$0xff]  ;;  %v291_v1 = vld [vmem:[%s399_s1 + $0x30] sm:$0xff]  ;;  %v41_v2 = vld [vmem:[%s399_s1 + $0x40] sm:$0x3] }
   0x2   :  { %105 = vmatpush.bf16.msra.mxu0 %v292_v0  ;;  %v79_v3 = vunpack.c.l.b16 %v41_v2  ;;  %v300_v4 = vld [vmem:[%s400_s3 + $0x38] sm:$0xff]  ;;  %v22_v5 = vld [vmem:[%s401_s0 + $0x8] sm:$0xff]  ;;  %v299_v7 = vld [vmem:[%s400_s3 + $0x30] sm:$0xff] }
   0x3   :  { %201 = vmatpush.bf16.msra.mxu2 %v300_v4  ;;  %v290_v8 = vld [vmem:[%s399_s1 + $0x28] sm:$0xff]  ;;  %v24_v10 = vpack.c.bf16 %v22_v5, %v22_v5  ;;  %v289_v12 = vld [vmem:[%s399_s1 + $0x20] sm:$0xff]  ;;  %v288_v14 = vld [vmem:[%s399_s1 + $0x18] sm:$0xff] }
   0x4   :  { %v88_v6 = vpack.c.b16 %v79_v3, %v79_v3  ;;  %v298_v11 = vld [vmem:[%s400_s3 + $0x28] sm:$0xff]  ;;  %v297_v13 = vld [vmem:[%s400_s3 + $0x20] sm:$0xff]  ;;  %v287_v15 = vld [vmem:[%s399_s1 + $0x10] sm:$0xff] }
   0x5   :  { %v286_v16 = vld [vmem:[%s399_s1 + $0x8] sm:$0xff]  ;;  %v285_v17 = vld [vmem:[%s399_s1] sm:$0xff]  ;;  %v296_v20 = vld [vmem:[%s400_s3 + $0x18] sm:$0xff] }
   0x6   :  { %106 = vmatpush.bf16.msra.mxu0 %v291_v1  ;;  %v103_v9 = vsel %vm101_vm0, %v88_v6, 0  ;;  %v21_v18 = vld [vmem:[%s401_s0] sm:$0xff]  ;;  %v295_v21 = vld [vmem:[%s400_s3 + $0x10] sm:$0xff]  ;;  %v294_v22 = vld [vmem:[%s400_s3 + $0x8] sm:$0xff] }
   0x7   :  { %125 = vmatpush.bf16.msra.mxu1 %v103_v9  ;;  %202 = vmatpush.bf16.msra.mxu2 %v299_v7  ;;  %v23_v19 = vpack.c.bf16 %v21_v18, %v21_v18  ;;  %v293_v23 = vld [vmem:[%s400_s3] sm:$0xff] }
   0x8   :  { %v301_v26 = vld [vmem:[%s402_s2] ss:$0 sm:$0xff] }
   0x9   :  { %v302_v33 = vld [vmem:[%s403_s4] ss:$0 sm:$0xff] }
   0xa   :  { %107 = vmatpush.bf16.msra.mxu0 %v290_v8  ;;  %252 = vmatmul.msk.bf16.vlgmr.msra.gmra.mxu1 %vm97_vm1, %v24_v10 }
   0xb   :  { %203 = vmatpush.bf16.msra.mxu2 %v298_v11 }
   0xe   :  { %108 = vmatpush.bf16.msra.mxu0 %v289_v12 }
   0xf   :  { %204 = vmatpush.bf16.msra.mxu2 %v297_v13 }
  0x12   :  { %109 = vmatpush.bf16.msra.mxu0 %v288_v14 }
  0x13   :  { %205 = vmatpush.bf16.msra.mxu2 %v296_v20 }
  0x16   :  { %110 = vmatpush.bf16.msra.mxu0 %v287_v15 }
  0x17   :  { %206 = vmatpush.bf16.msra.mxu2 %v295_v21 }
  0x1a   :  { %111 = vmatpush.bf16.msra.mxu0 %v286_v16 }
  0x1b   :  { %207 = vmatpush.bf16.msra.mxu2 %v294_v22 }
  0x1e   :  { %112 = vmatpush.bf16.msra.mxu0 %v285_v17 }
  0x1f   :  { %208 = vmatpush.bf16.msra.mxu2 %v293_v23 }
  0x21   :  { %113 = vmatmul.bf16.vlgmr.msra.gmra.mxu0 %v23_v19 }
  0x87   :  { %v127_v24 = vpop.f32.mrf.mxu1 }
  0x8f   :  { %v129_v25 = vpop.f32.mrf.mxu1 }
  0x9e   :  { %v114_v27 = vpop.f32.mrf.mxu0 }
  0x9f   :  { %v115_v28 = vadd.f32 %v301_v26, %v114_v27 }
  0xa1   :  { %v128_v29 = vadd.f32 %v127_v24, %v115_v28 }
  0xa3   :  { %v131_v30 = vmax.f32 %v128_v29, 0.0 }
  0xa5   :  { %v132_v31 = vpack.c.bf16 %v131_v30, %v131_v30 }
  0xa6   :  { %v116_v32 = vpop.f32.mrf.mxu0 }
  0xa7   :  { %209 = vmatmul.bf16.vlgmr.msra.gmra.mxu2 %v132_v31 }
 0x12a   :  { %v210_v34 = vpop.f32.mrf.mxu2 }
 0x12b   :  { %v211_v35 = vadd.f32 %v302_v33, %v210_v34 }
 0x12d   :  { %215 = vst.msk [vmem:[%s404_s5] sm:$0xff] %vm214_vm2, %v211_v35 }
 0x132   :  { %v212_v36 = vpop.f32.mrf.mxu2 }

</bundles_post_ra>
